<compile_context>
chip_gen: v5e
topology: v5e:2x2
jax: 0.10.0
libtpu: 0.0.40
codegen_flags: <defaults>
</compile_context>

<pallas_src>
import jax
import jax.numpy as jnp
from jax.experimental import pallas as pl
from jax.experimental.pallas import tpu as pltpu

CIFAR10_MEAN = (0.4914, 0.4822, 0.4465)
CIFAR10_STD = (0.2471, 0.2435, 0.2616)
NUM_CLASSES = 10
PAD_CLASSES = 128   # lane-dense padded class dim; sliced back to 10 outside the kernel
TN_MAX = 512        # batch-tile rows: 512 x 3072 bf16 = 3 MiB/buffer -> fits v5e/v6e/v7x scoped VMEM


def _round_up(x, m):
    return ((x + m - 1) // m) * m


def postmodel_kernel(x_ref, w_ref, b_ref, o_ref):
    # Normalization is pre-folded into w/b, so the body is a pure MXU matmul
    # with an f32 accumulator and a lane-dense (TN, 128) output store.
    o_ref[...] = (
        jnp.dot(x_ref[...], w_ref[...], preferred_element_type=jnp.float32)
        + b_ref[...]
    )


def fold_normalization(w, b, C, H, W):
    """One-time fold of (x - mean)/std into the linear head:  xn @ W + b == x @ W' + b'."""
    D = C * H * W
    mean = jnp.asarray(CIFAR10_MEAN, jnp.float32)
    std = jnp.asarray(CIFAR10_STD, jnp.float32)
    # NCHW flattened row-major: channel is slowest within a row -> contiguous H*W runs.
    scale = jnp.repeat(1.0 / std, H * W).reshape(D, 1)        # (D, 1)
    bias = jnp.repeat(-mean / std, H * W).reshape(1, D)       # (1, D)
    w_fold = scale * w                                        # (D, 10)
    b_fold = bias @ w + b.reshape(1, NUM_CLASSES)             # (1, 10)
    # Pad class dim to 128 lanes for an unmasked, lane-dense output store.
    w_pad = jnp.zeros((D, PAD_CLASSES), jnp.float32).at[:, :NUM_CLASSES].set(w_fold)
    b_pad = jnp.zeros((1, PAD_CLASSES), jnp.float32).at[:, :NUM_CLASSES].set(b_fold)
    # bf16 weights halve HBM/VMEM traffic; accumulation stays f32 inside the kernel.
    return w_pad.astype(jnp.bfloat16), b_pad


@jax.jit
def post_model_forward(images, w_fold, b_fold):
    # layout: PyTorch NCHW input (N, C, H, W) flattened row-major to (N, C*H*W),
    # matching torch .view(N, -1).
    N, C, H, W = images.shape
    D = C * H * W
    x2 = images.reshape(N, D).astype(jnp.bfloat16)

    # Batch-tile the grid; pad N to a multiple of the tile (bf16 sublane packing -> 16-row
    # minimum). Resident weights + <=512-row bf16 tiles keep VMEM bounded on all generations.
    tn = min(TN_MAX, _round_up(N, 16))
    n_pad = _round_up(N, tn)
    if n_pad != N:
        x2 = jnp.zeros((n_pad, D), jnp.bfloat16).at[:N].set(x2)

    cost = pl.CostEstimate(
        flops=2 * n_pad * D * PAD_CLASSES,
        bytes_accessed=n_pad * D * 2 + D * PAD_CLASSES * 2
        + PAD_CLASSES * 4 + n_pad * PAD_CLASSES * 4,
        transcendentals=0,
    )

    out = pl.pallas_call(
        postmodel_kernel,
        out_shape=jax.ShapeDtypeStruct((n_pad, PAD_CLASSES), jnp.float32),
        grid=(n_pad // tn,),
        in_specs=[
            pl.BlockSpec((tn, D), lambda i: (i, 0)),              # batch-tiled activations
            pl.BlockSpec((D, PAD_CLASSES), lambda i: (0, 0)),     # weights stay resident
            pl.BlockSpec((1, PAD_CLASSES), lambda i: (0, 0)),     # bias stays resident
        ],
        out_specs=pl.BlockSpec((tn, PAD_CLASSES), lambda i: (i, 0)),
        compiler_params=pltpu.CompilerParams(
            # Batch axis is embarrassingly parallel -> v7x shards it across both TCs;
            # no-op on single-TC v5e/v6e.
            dimension_semantics=("parallel",),
        ),
        cost_estimate=cost,
    )(x2, w_fold, b_fold)
    # Drop batch padding and padded class lanes (zero columns) outside the kernel.
    return out[:N, :NUM_CLASSES]


if __name__ == "__main__":
    key = jax.random.PRNGKey(0)
    k_img, k_w, k_b = jax.random.split(key, 3)

    # Small shapes consistent with the module: CIFAR-like NCHW images in [0, 1).
    N, C, H, W = 2, 3, 16, 16
    images = jax.random.uniform(k_img, (N, C, H, W), dtype=jnp.float32)

    # Deterministic stand-in classifier parameters (linear head over C*H*W pixels).
    D = C * H * W
    w = jax.random.normal(k_w, (D, NUM_CLASSES), dtype=jnp.float32) * 0.02
    b = jax.random.normal(k_b, (NUM_CLASSES,), dtype=jnp.float32) * 0.01

    # One-time parameter folding (normalization -> weights), hoisted out of the hot path.
    w_fold, b_fold = fold_normalization(w, b, C, H, W)

    logits = post_model_forward(images, w_fold, b_fold)
    logits = jax.block_until_ready(logits)

    # Reference check (pure f32 JAX) of the normalize + linear semantics.
    mean = jnp.asarray(CIFAR10_MEAN, jnp.float32).reshape(1, C, 1, 1)
    std = jnp.asarray(CIFAR10_STD, jnp.float32).reshape(1, C, 1, 1)
    xn_ref = (images - mean) / std
    ref = xn_ref.reshape(N, D) @ w + b

    assert logits.shape == (N, NUM_CLASSES)
    # bf16 activations/weights with f32 accumulation -> loose tolerance vs the f32 reference.
    assert jnp.allclose(logits, ref, atol=5e-2, rtol=5e-2)

    print("KERNEL_OK")
</pallas_src>

<mosaic_0001>
module attributes {stable_mosaic.version = 11 : i64} {
  func.func @postmodel_kernel(%arg0: i32, %arg1: memref<16x768xbf16, #tpu.memory_space<vmem>>, %arg2: memref<768x128xbf16, #tpu.memory_space<vmem>>, %arg3: memref<1x128xf32, #tpu.memory_space<vmem>>, %arg4: memref<16x128xf32, #tpu.memory_space<vmem>>) attributes {dimension_semantics = [#tpu.dimension_semantics<parallel>], iteration_bounds = array<i64: 1>, scalar_prefetch = 0 : i64, scratch_operands = 0 : i64, tpu.core_type = #tpu.core_type<tc>, window_params = [{transform_indices = @transform_0, window_bounds = array<i64: 16, 768>}, {pipeline_mode = #tpu.pipeline_mode<synchronous>, transform_indices = @transform_1, window_bounds = array<i64: 768, 128>}, {pipeline_mode = #tpu.pipeline_mode<synchronous>, transform_indices = @transform_2, window_bounds = array<i64: 1, 128>}, {transform_indices = @transform_3, window_bounds = array<i64: 16, 128>}]} {
    %c0 = arith.constant 0 : index
    %c0_0 = arith.constant 0 : index
    %0 = vector.load %arg1[%c0, %c0_0] : memref<16x768xbf16, #tpu.memory_space<vmem>>, vector<16x768xbf16>
    %c0_1 = arith.constant 0 : index
    %c0_2 = arith.constant 0 : index
    %1 = vector.load %arg2[%c0_1, %c0_2] : memref<768x128xbf16, #tpu.memory_space<vmem>>, vector<768x128xbf16>
    %cst = arith.constant dense<0.000000e+00> : vector<16x128xf32>
    %2 = tpu.matmul %0, %1, %cst {dimension_numbers = #tpu.dot_dimension_numbers<[1], [0], [0], [1], [0, 0, 1, 1], [], []>} : vector<16x768xbf16>, vector<768x128xbf16>, vector<16x128xf32> -> vector<16x128xf32>
    %c0_3 = arith.constant 0 : index
    %c0_4 = arith.constant 0 : index
    %3 = vector.load %arg3[%c0_3, %c0_4] : memref<1x128xf32, #tpu.memory_space<vmem>>, vector<1x128xf32>
    %4 = vector.broadcast %3 : vector<1x128xf32> to vector<16x128xf32>
    %5 = arith.addf %2, %4 : vector<16x128xf32>
    %c0_5 = arith.constant 0 : index
    %c0_6 = arith.constant 0 : index
    %6 = vector.load %arg4[%c0_5, %c0_6] : memref<16x128xf32, #tpu.memory_space<vmem>>, vector<16x128xf32>
    tpu.vector_store %arg4[%c0_5, %c0_6], %5 {strides = array<i32>} : memref<16x128xf32, #tpu.memory_space<vmem>>, vector<16x128xf32>,
    return
  }
  func.func @transform_0(%arg0: i32) -> (i32, i32) {
    %c0_i32 = arith.constant 0 : i32
    %c0_i32_0 = arith.constant 0 : i32
    return %arg0, %c0_i32 : i32, i32
  }
  func.func @transform_1(%arg0: i32) -> (i32, i32) {
    %c0_i32 = arith.constant 0 : i32
    %c0_i32_0 = arith.constant 0 : i32
    %c0_i32_1 = arith.constant 0 : i32
    return %c0_i32, %c0_i32_0 : i32, i32
  }
  func.func @transform_2(%arg0: i32) -> (i32, i32) {
    %c0_i32 = arith.constant 0 : i32
    %c0_i32_0 = arith.constant 0 : i32
    %c0_i32_1 = arith.constant 0 : i32
    return %c0_i32, %c0_i32_0 : i32, i32
  }
  func.func @transform_3(%arg0: i32) -> (i32, i32) {
    %c0_i32 = arith.constant 0 : i32
    %c0_i32_0 = arith.constant 0 : i32
    return %arg0, %c0_i32 : i32, i32
  }
}

</mosaic_0001>

<bundles_post_ra>
// kernel: post_model_forward.1
= control target key start
LH: loop header
LB: loop body
LE: loop exit
PB: predicated region body
PF: predicated region fallthrough
CT: control target
= control target key end

     0   :  { %8 = vsyncpa [#allocation3], 0  ;;  %s845_s15 = smov [#allocation2]   ;;  %s846_s17 = smov 64   ;;  %s916_s0 = inlined_call_operand.vmem [shape: bf16[16,768], index: 0, kind: input, shape index: {}]   ;;  %s917_s1 = inlined_call_operand.hbm [shape: bf16[768,128], index: 1, kind: input, shape index: {}]   ;;  %s918_s2 = inlined_call_operand.vmem [shape: f32[1,128], index: 2, kind: input, shape index: {}]   ;;  %s919_s3 = inlined_call_operand.vmem [shape: f32[16,128], index: 3, kind: output, shape index: {}]  }
   0x1   :  { %s15_s14 = sshll.u32 %s917_s1, 4  ;;  %s17_s16 = sshll.u32 %s845_s15, 4  ;;  %s16_s14 = int_to_ptr.hbm [resolvable:$true] %s15_s14  ;;  %s18_s16 = int_to_ptr.vmem [resolvable:$true] %s17_s16 }
   0x2   :  { %s847_s18 = smov 4  }
   0x3   :  { %23 = dma.hbm_to_vmem [thread:$0]  %s16_s14, 6144, %s18_s16, [#allocation3], %s846_s17, %s846_s17, %s847_s18  }
   0x4   :  { %843 = dma.done.wait [#allocation3], 6144  }
   0x5   :  { %844 = vsyncadd [#allocation3], 4294961152  ;;  %v774_v0 = vld [vmem:[#allocation2 + $0x38] sm:$0xff]  ;;  %v773_v4 = vld [vmem:[#allocation2 + $0x30] sm:$0xff] }
   0x6   :  { %v782_v1 = vld [vmem:[#allocation2 + $0x78] sm:$0xff]  ;;  %454 = vmatpush.bf16.msra.mxu0 %v774_v0  ;;  %v781_v5 = vld [vmem:[#allocation2 + $0x70] sm:$0xff]  ;;  %v772_v8 = vld [vmem:[#allocation2 + $0x28] sm:$0xff] }
   0x7   :  { %v790_v2 = vld [vmem:[#allocation2 + $0xb8] sm:$0xff]  ;;  %468 = vmatpush.bf16.msra.mxu1 %v782_v1  ;;  %v789_v6 = vld [vmem:[#allocation2 + $0xb0] sm:$0xff]  ;;  %v780_v9 = vld [vmem:[#allocation2 + $0x68] sm:$0xff] }
   0x8   :  { %v798_v3 = vld [vmem:[#allocation2 + $0xf8] sm:$0xff]  ;;  %482 = vmatpush.bf16.msra.mxu2 %v790_v2  ;;  %v797_v7 = vld [vmem:[#allocation2 + $0xf0] sm:$0xff]  ;;  %v788_v10 = vld [vmem:[#allocation2 + $0xa8] sm:$0xff] }
   0x9   :  { %496 = vmatpush.bf16.msra.mxu3 %v798_v3  ;;  %v796_v11 = vld [vmem:[#allocation2 + $0xe8] sm:$0xff]  ;;  %v771_v12 = vld [vmem:[#allocation2 + $0x20] sm:$0xff]  ;;  %v770_v16 = vld [vmem:[#allocation2 + $0x18] sm:$0xff] }
   0xa   :  { %455 = vmatpush.bf16.msra.mxu0 %v773_v4  ;;  %v779_v13 = vld [vmem:[#allocation2 + $0x60] sm:$0xff]  ;;  %v778_v17 = vld [vmem:[#allocation2 + $0x58] sm:$0xff]  ;;  %v769_v20 = vld [vmem:[#allocation2 + $0x10] sm:$0xff] }
   0xb   :  { %469 = vmatpush.bf16.msra.mxu1 %v781_v5  ;;  %v787_v14 = vld [vmem:[#allocation2 + $0xa0] sm:$0xff]  ;;  %v786_v18 = vld [vmem:[#allocation2 + $0x98] sm:$0xff]  ;;  %v777_v21 = vld [vmem:[#allocation2 + $0x50] sm:$0xff] }
   0xc   :  { %483 = vmatpush.bf16.msra.mxu2 %v789_v6  ;;  %v795_v15 = vld [vmem:[#allocation2 + $0xe0] sm:$0xff]  ;;  %v794_v19 = vld [vmem:[#allocation2 + $0xd8] sm:$0xff]  ;;  %v785_v22 = vld [vmem:[#allocation2 + $0x90] sm:$0xff] }
   0xd   :  { %497 = vmatpush.bf16.msra.mxu3 %v797_v7  ;;  %v793_v23 = vld [vmem:[#allocation2 + $0xd0] sm:$0xff]  ;;  %v768_v24 = vld [vmem:[#allocation2 + $0x8] sm:$0xff]  ;;  %v767_v28 = vld [vmem:[#allocation2] sm:$0xff] }
   0xe   :  { %456 = vmatpush.bf16.msra.mxu0 %v772_v8  ;;  %v776_v25 = vld [vmem:[#allocation2 + $0x48] sm:$0xff]  ;;  %v775_v29 = vld [vmem:[#allocation2 + $0x40] sm:$0xff]  ;;  %v764_v31 = vld [vmem:[%s916_s0 + $0x14] sm:$0xf0] }
   0xf   :  { %470 = vmatpush.bf16.msra.mxu1 %v780_v9  ;;  %v784_v26 = vld [vmem:[#allocation2 + $0x88] sm:$0xff]  ;;  %v547_v30 = vld [vmem:[%s916_s0] sm:$0xf]  ;;  %v761_v32 = vld [vmem:[%s916_s0 + $0x4] sm:$0xf] }
  0x10   :  { %484 = vmatpush.bf16.msra.mxu2 %v788_v10  ;;  %v792_v27 = vld [vmem:[#allocation2 + $0xc8] sm:$0xff]  ;;  %v549_v33 = vld [vmem:[%s916_s0 + $0x18] sm:$0xf0]  ;;  %v783_v36 = vld [vmem:[#allocation2 + $0x80] sm:$0xff]  ;;  %v548_v40 = vor.u32 %v764_v31, %v547_v30 }
  0x11   :  { %498 = vmatpush.bf16.msra.mxu3 %v796_v11  ;;  %v806_v34 = vld [vmem:[#allocation2 + $0x138] sm:$0xff]  ;;  %v791_v37 = vld [vmem:[#allocation2 + $0xc0] sm:$0xff]  ;;  %v555_v38 = vld [vmem:[%s916_s0 + $0x8] sm:$0xf]  ;;  %v552_v43 = vor.u32 %v761_v32, %v549_v33 }
  0x12   :  { %457 = vmatpush.bf16.msra.mxu0 %v771_v12  ;;  %v814_v35 = vld [vmem:[#allocation2 + $0x178] sm:$0xff]  ;;  %v765_v39 = vld [vmem:[%s916_s0 + $0x1c] sm:$0xf0]  ;;  %v762_v41 = vld [vmem:[%s916_s0 + $0xc] sm:$0xf] }
  0x13   :  { %471 = vmatpush.bf16.msra.mxu1 %v779_v13  ;;  %v557_v42 = vld [vmem:[%s916_s0 + $0x20] sm:$0xf0]  ;;  %v805_v44 = vld [vmem:[#allocation2 + $0x130] sm:$0xff]  ;;  %v556_v46 = vor.u32 %v765_v39, %v555_v38  ;;  %v804_v48 = vld [vmem:[#allocation2 + $0x128] sm:$0xff] }
  0x14   :  { %485 = vmatpush.bf16.msra.mxu2 %v787_v14  ;;  %v813_v45 = vld [vmem:[#allocation2 + $0x170] sm:$0xff]  ;;  %v560_v47 = vor.u32 %v762_v41, %v557_v42  ;;  %v812_v49 = vld [vmem:[#allocation2 + $0x168] sm:$0xff]  ;;  %v803_v50 = vld [vmem:[#allocation2 + $0x120] sm:$0xff] }
  0x15   :  { %499 = vmatpush.bf16.msra.mxu3 %v795_v15  ;;  %v811_v51 = vld [vmem:[#allocation2 + $0x160] sm:$0xff]  ;;  %v802_v52 = vld [vmem:[#allocation2 + $0x118] sm:$0xff]  ;;  %v801_v54 = vld [vmem:[#allocation2 + $0x110] sm:$0xff] }
  0x16   :  { %458 = vmatpush.bf16.msra.mxu0 %v770_v16  ;;  %v810_v53 = vld [vmem:[#allocation2 + $0x158] sm:$0xff]  ;;  %v809_v55 = vld [vmem:[#allocation2 + $0x150] sm:$0xff]  ;;  %v800_v56 = vld [vmem:[#allocation2 + $0x108] sm:$0xff] }
  0x17   :  { %472 = vmatpush.bf16.msra.mxu1 %v778_v17  ;;  %v808_v57 = vld [vmem:[#allocation2 + $0x148] sm:$0xff]  ;;  %v799_v58 = vld [vmem:[#allocation2 + $0x100] sm:$0xff]  ;;  %v563_v60 = vld [vmem:[%s916_s0 + $0x10] sm:$0xf] }
  0x18   :  { %486 = vmatpush.bf16.msra.mxu2 %v786_v18  ;;  %v807_v59 = vld [vmem:[#allocation2 + $0x140] sm:$0xff]  ;;  %v766_v61 = vld [vmem:[%s916_s0 + $0x24] sm:$0xf0]  ;;  %v763_v62 = vld [vmem:[%s916_s0 + $0x14] sm:$0xf] }
  0x19   :  { %500 = vmatpush.bf16.msra.mxu3 %v794_v19  ;;  %v565_v63 = vld [vmem:[%s916_s0 + $0x28] sm:$0xf0]  ;;  %v564_v0 = vor.u32 %v766_v61, %v563_v60  ;;  %v818_v4 = vld [vmem:[%s918_s2] ss:$0 sm:$0xff] }
  0x1a   :  { %459 = vmatpush.bf16.msra.mxu0 %v769_v20  ;;  %v568_v1 = vor.u32 %v763_v62, %v565_v63 }
  0x1b   :  { %473 = vmatpush.bf16.msra.mxu1 %v777_v21 }
  0x1c   :  { %487 = vmatpush.bf16.msra.mxu2 %v785_v22 }
  0x1d   :  { %501 = vmatpush.bf16.msra.mxu3 %v793_v23 }
  0x1e   :  { %460 = vmatpush.bf16.msra.mxu0 %v768_v24 }
  0x1f   :  { %474 = vmatpush.bf16.msra.mxu1 %v776_v25 }
  0x20   :  { %488 = vmatpush.bf16.msra.mxu2 %v784_v26 }
  0x21   :  { %502 = vmatpush.bf16.msra.mxu3 %v792_v27 }
  0x22   :  { %461 = vmatpush.bf16.msra.mxu0 %v767_v28 }
  0x23   :  { %475 = vmatpush.bf16.msra.mxu1 %v775_v29 }
  0x24   :  { %489 = vmatpush.bf16.msra.mxu2 %v783_v36 }
  0x25   :  { %503 = vmatpush.bf16.msra.mxu3 %v791_v37  ;;  %462 = vmatmul.bf16.vlgmr.msra.gmra.mxu0 %v548_v40 }
  0x26   :  { %510 = vmatpush.bf16.msrb.mxu0 %v806_v34  ;;  %476 = vmatmul.bf16.vlgmr.msra.gmra.mxu1 %v552_v43 }
  0x27   :  { %524 = vmatpush.bf16.msrb.mxu1 %v814_v35  ;;  %490 = vmatmul.bf16.vlgmr.msra.gmra.mxu2 %v556_v46 }
  0x28   :  { %504 = vmatmul.bf16.vlgmr.msra.gmra.mxu3 %v560_v47 }
  0x2a   :  { %511 = vmatpush.bf16.msrb.mxu0 %v805_v44 }
  0x2b   :  { %525 = vmatpush.bf16.msrb.mxu1 %v813_v45 }
  0x2e   :  { %512 = vmatpush.bf16.msrb.mxu0 %v804_v48 }
  0x2f   :  { %526 = vmatpush.bf16.msrb.mxu1 %v812_v49 }
  0x32   :  { %513 = vmatpush.bf16.msrb.mxu0 %v803_v50 }
  0x33   :  { %527 = vmatpush.bf16.msrb.mxu1 %v811_v51 }
  0x36   :  { %514 = vmatpush.bf16.msrb.mxu0 %v802_v52 }
  0x37   :  { %528 = vmatpush.bf16.msrb.mxu1 %v810_v53 }
  0x3a   :  { %515 = vmatpush.bf16.msrb.mxu0 %v801_v54 }
  0x3b   :  { %529 = vmatpush.bf16.msrb.mxu1 %v809_v55 }
  0x3e   :  { %516 = vmatpush.bf16.msrb.mxu0 %v800_v56 }
  0x3f   :  { %530 = vmatpush.bf16.msrb.mxu1 %v808_v57 }
  0x42   :  { %517 = vmatpush.bf16.msrb.mxu0 %v799_v58 }
  0x43   :  { %531 = vmatpush.bf16.msrb.mxu1 %v807_v59 }
  0x45   :  { %518 = vmatmul.bf16.vlgmr.msrb.gmra.mxu0 %v564_v0 }
  0x46   :  { %532 = vmatmul.bf16.vlgmr.msrb.gmra.mxu1 %v568_v1 }
  0xa2   :  { %v463_v2 = vpop.f32.mrf.mxu0 }
  0xa3   :  { %v477_v3 = vpop.f32.mrf.mxu1  ;;  %v464_v5 = vadd.f32 %v818_v4, %v463_v2 }
  0xa5   :  { %v478_v7 = vadd.f32 %v477_v3, %v464_v5 }
  0xaa   :  { %v491_v6 = vpop.f32.mrf.mxu2  ;;  %v465_v8 = vpop.f32.mrf.mxu0 }
  0xab   :  { %v479_v9 = vpop.f32.mrf.mxu1  ;;  %v505_v10 = vpop.f32.mrf.mxu3  ;;  %v492_v11 = vadd.f32 %v491_v6, %v478_v7  ;;  %v466_v12 = vadd.f32 %v818_v4, %v465_v8 }
  0xad   :  { %v506_v13 = vadd.f32 %v505_v10, %v492_v11  ;;  %v480_v14 = vadd.f32 %v479_v9, %v466_v12 }
  0xb2   :  { %v493_v15 = vpop.f32.mrf.mxu2 }
  0xb3   :  { %v494_v19 = vadd.f32 %v493_v15, %v480_v14  ;;  %v507_v21 = vpop.f32.mrf.mxu3 }
  0xb5   :  { %v508_v22 = vadd.f32 %v507_v21, %v494_v19 }
  0xc2   :  { %v519_v16 = vpop.f32.mrf.mxu0 }
  0xc3   :  { %v533_v17 = vpop.f32.mrf.mxu1  ;;  %v520_v18 = vadd.f32 %v519_v16, %v506_v13 }
  0xc5   :  { %v534_v20 = vadd.f32 %v533_v17, %v520_v18 }
  0xc7   :  { %538 = vst [vmem:[%s919_s3] sm:$0xff] %v534_v20 }
  0xca   :  { %v521_v23 = vpop.f32.mrf.mxu0 }
  0xcb   :  { %v522_v24 = vadd.f32 %v521_v23, %v508_v22  ;;  %v535_v25 = vpop.f32.mrf.mxu1 }
  0xcd   :  { %v536_v26 = vadd.f32 %v535_v25, %v522_v24 }
  0xcf   :  { %539 = vst [vmem:[%s919_s3 + $0x8] sm:$0xff] %v536_v26 }
  0xd0   :  { %544 = vsyncpa [#allocation3], 1 }

</bundles_post_ra>
